<compile_context>
chip_gen: v6e
topology: v6e:2x2x1
jax: 0.10.0
libtpu: 0.0.40
codegen_flags: <defaults>
</compile_context>

<pallas_src>
import math

import jax
import jax.numpy as jnp
import numpy as np
from jax import lax
from jax.experimental import pallas as pl
from jax.experimental.pallas import tpu as pltpu

LEAKY_SLOPE = 0.01  # F.leaky_relu default negative_slope


# ----------------------------- parameter prep -------------------------------


def init_params(key, input_c, input_h, input_w, kernel_sizes, extra_padding):
    """Deterministic synthetic init (xavier-normal weights, small random biases)."""
    relu_gain = math.sqrt(2.0)
    leaky_gain = math.sqrt(2.0 / (1.0 + LEAKY_SLOPE ** 2))

    def xavier(k, shape, fan_in, fan_out, gain):
        std = gain * math.sqrt(2.0 / (fan_in + fan_out))
        return std * jax.random.normal(k, shape, jnp.float32)

    n_conv = len(kernel_sizes)
    keys = jax.random.split(key, 2 * n_conv + 6)
    conv = []
    c, h, w = input_c, input_h, input_w
    for i, (k, ep) in enumerate(zip(kernel_sizes, extra_padding)):
        co = 2 * c
        wgt = xavier(keys[2 * i], (co, c, k, k), c * k * k, co * k * k, relu_gain)
        bia = 0.1 * jax.random.normal(keys[2 * i + 1], (co,), jnp.float32)
        conv.append((wgt, bia))
        h = h // 2 + ep
        w = w // 2 + ep
        c = co
    d = h * w * c
    kl = keys[2 * n_conv:]
    lin = [
        (xavier(kl[0], (20, d), d, 20, leaky_gain),
         0.1 * jax.random.normal(kl[1], (20,), jnp.float32)),
        (xavier(kl[2], (3, 20), 20, 3, leaky_gain),
         0.1 * jax.random.normal(kl[3], (3,), jnp.float32)),
        (xavier(kl[4], (1, 3), 3, 1, 1.0),
         0.1 * jax.random.normal(kl[5], (1,), jnp.float32)),
    ]
    return {"conv": conv, "lin": lin, "linear_input_dim": d}


def prepare_params(params, input_c, input_h, input_w, kernel_sizes, extra_padding):
    """One-time rearrangement of the PyTorch-layout weights into two packed slabs."""
    assert tuple(kernel_sizes) == (3, 3) and tuple(extra_padding) == (0, 0), (
        "fused kernel is specialized to two 3x3 / pad-1 conv+pool blocks")
    (w1, b1), (w2, b2) = params["conv"]
    (l1w, l1b), (l2w, l2b), (l3w, l3b) = params["lin"]
    C0, H, W = input_c, input_h, input_w
    C1, C2 = 2 * C0, 4 * C0
    Hp1, Wp1 = H // 2, W // 2
    Hp2, Wp2 = Hp1 // 2, Wp1 // 2
    assert Hp1 % 2 == 0 and Wp1 % 2 == 0 and Hp2 >= 2
    assert params["linear_input_dim"] == Hp2 * Wp2 * C2
    L1 = (W + 2) * C0                         # padded input cols folded into lanes
    KB1 = -(-(3 * L1 + 1) // 8) * 8           # block-1 contraction width (+bias lane, padded)
    WC1, WC2 = Wp1 * C1, Wp2 * C2             # pooled row widths (always equal)
    assert WC2 == WC1 and Hp2 * 20 <= 2 * WC2 and WC2 <= 128

    w1n, b1n = np.asarray(w1, np.float32), np.asarray(b1, np.float32)
    w2n, b2n = np.asarray(w2, np.float32), np.asarray(b2, np.float32)
    l1wn, l1bn = np.asarray(l1w, np.float32), np.asarray(l1b, np.float32)
    l2wn, l2bn = np.asarray(l2w, np.float32), np.asarray(l2b, np.float32)
    l3wn, l3bn = np.asarray(l3w, np.float32), np.asarray(l3b, np.float32)

    # --- block-1 banded weight: ky taps stacked along the contraction, bias in
    #     row 3*L1 (matches the constant-1 lane of the LHS).  Columns are laid
    #     out as dx*WC1 + jp*C1 + co so the W max-pool is a lane-half max.
    T1 = np.zeros((KB1, 2 * WC1), np.float32)
    for kyi in range(3):
        for jp in range(Wp1):
            for dx in range(2):
                for kx in range(3):
                    wcol = 2 * jp + dx + kx          # physically padded input col
                    r0 = kyi * L1 + wcol * C0
                    c0 = dx * WC1 + jp * C1
                    T1[r0:r0 + C0, c0:c0 + C1] = w1n[:, :, kyi, kx].T
    T1[3 * L1, :] = np.tile(b1n, 2 * Wp1)

    # --- block-2 banded weight: ky taps stacked along the contraction, the W
    #     padding folded into the band (taps on padding dropped).
    T2 = np.zeros((3 * WC1, 2 * WC2), np.float32)
    for kyi in range(3):
        for jp in range(Wp2):
            for dx in range(2):
                for kx in range(3):
                    wcol = 2 * jp + dx + kx - 1
                    if 0 <= wcol < Wp1:
                        r0 = kyi * WC1 + wcol * C1
                        c0 = dx * WC2 + jp * C2
                        T2[r0:r0 + C1, c0:c0 + C2] = w2n[:, :, kyi, kx].T

    # --- linear_1 permuted to the kernel's (ip2, jp2, c2) feature layout and
    #     concatenated over ip2 along output columns (diagonal-block form).
    WL = np.zeros((WC2, 2 * WC2), np.float32)
    for ip2 in range(Hp2):
        for jp2 in range(Wp2):
            for c2 in range(C2):
                WL[jp2 * C2 + c2, ip2 * 20:(ip2 + 1) * 20] = \
                    l1wn[:, c2 * Hp2 * Wp2 + ip2 * Wp2 + jp2]

    w_slab = np.concatenate([T1, T2, WL], axis=0)   # (KB1 + 3*WC1 + WC2, 2*WC1)

    # --- every small vector packed into one (8,128) slab ---
    v = np.zeros((8, 128), np.float32)
    v[0, :WC2] = np.tile(b2n, Wp2)    # conv2 bias, tiled over pooled columns
    v[1, :20] = l1bn                  # linear_1 bias
    v[2:5, :20] = l2wn                # linear_2 weight rows
    v[5, :3] = l2bn                   # linear_2 bias
    v[6, :3] = l3wn[0]                # linear_3 weight
    v[7, 0] = l3bn[0]                 # linear_3 bias

    return {"w_slab": jnp.asarray(w_slab), "v_slab": jnp.asarray(v)}


# ----------------------------- fused forward --------------------------------


def fused_forward(prep, x_nchw):
    N, C0, H, W = x_nchw.shape
    C1, C2 = 2 * C0, 4 * C0
    Hp1, Wp1 = H // 2, W // 2
    Hp2, Wp2 = Hp1 // 2, Wp1 // 2
    Hh = Hp1 // 2                               # == Hp2
    assert H % 2 == 0 and W % 2 == 0 and Hp1 % 2 == 0 and Wp1 % 2 == 0 and Hh >= 2
    L1 = (W + 2) * C0
    KB1 = -(-(3 * L1 + 1) // 8) * 8
    WC1, WC2 = Wp1 * C1, Wp2 * C2
    assert WC2 == WC1 and Hp2 * 20 <= 2 * WC2 and WC2 <= 128
    assert prep["w_slab"].shape == (KB1 + 3 * WC1 + WC2, 2 * WC1)
    assert prep["v_slab"].shape == (8, 128)

    HpN, HhN = Hp1 * N, Hh * N

    # ---- wrapper: build block-1's LHS in one gather-style layout fusion ----
    # Row order: (dy, pooled-row-parity P, t, n) with conv row i1 = 4t+2P+dy, so
    # the dy max-pool in-kernel is an aligned HpN-row block max and block-2's
    # H-padding split falls on parity halves of y1.  Lanes: ky*L1 + w*C0 + ci,
    # plus one constant-1 lane (conv1 bias) and zero pad up to KB1.
    xp = jnp.pad(jnp.transpose(x_nchw, (0, 2, 3, 1)),
                 ((0, 0), (1, 1), (1, 1), (0, 0))).reshape(N, H + 2, L1)
    dy = np.arange(2); P = np.arange(2); t = np.arange(Hh); ky = np.arange(3)
    rows = (dy[:, None, None, None] + 2 * P[None, :, None, None]
            + 4 * t[None, None, :, None] + ky[None, None, None, :]).reshape(-1)
    g = jnp.take(xp, jnp.asarray(rows, dtype=jnp.int32), axis=1)    # (N, 12*Hh, L1)
    g = g.reshape(N, 2, 2, Hh, 3, L1).transpose(1, 2, 3, 0, 4, 5)
    g = g.reshape(2 * HpN, 3 * L1)
    a1 = jnp.concatenate(
        [g, jnp.ones((2 * HpN, 1), jnp.float32),
         jnp.zeros((2 * HpN, KB1 - 3 * L1 - 1), jnp.float32)], axis=1)  # (2*HpN, KB1)

    o_t1, o_t2, o_l1 = 0, KB1, KB1 + 3 * WC1

    def kernel(a1_ref, w_ref, v_ref, out_ref, x2_ref):
        f32 = jnp.float32
        # default matmul precision kept identical to the validated version; pin
        # lax.Precision.HIGHEST here if cross-generation bit-tolerance matters.

        # -------- block 1: conv3x3 (+bias folded) -> maxpool2 -> ReLU --------
        r1 = jnp.dot(a1_ref[...], w_ref[o_t1:o_t1 + KB1, :],
                     preferred_element_type=f32)              # (2*HpN, 2*WC1)
        c1 = jnp.maximum(r1[0:HpN, :], r1[HpN:2 * HpN, :])    # pool over dy (aligned)
        p1 = jnp.maximum(c1[:, 0:WC1], c1[:, WC1:2 * WC1])    # pool over dx
        y1 = jnp.maximum(p1, 0.0)                             # (2*HhN, WC1) rows (P,t,n)

        # -------- build block-2 LHS: ky folded into lanes, rows (dy2, ip2, n) ----
        # Band ky of row (dy2, ip2, n) holds block-2-padded input row 2*ip2+dy2+ky.
        # Only the two genuine padding row-bands are zero-filled.
        zrow = jnp.zeros((N, WC1), f32)
        x2_ref[:, WC1:2 * WC1] = y1                           # ky = 1 band == y1
        x2_ref[0:N, 0:WC1] = zrow                             # ky = 0 band
        x2_ref[N:HhN, 0:WC1] = y1[HhN:2 * HhN - N, :]
        x2_ref[HhN:2 * HhN, 0:WC1] = y1[0:HhN, :]
        x2_ref[0:HhN, 2 * WC1:3 * WC1] = y1[HhN:2 * HhN, :]   # ky = 2 band
        x2_ref[HhN:2 * HhN - N, 2 * WC1:3 * WC1] = y1[N:HhN, :]
        x2_ref[2 * HhN - N:2 * HhN, 2 * WC1:3 * WC1] = zrow

        # -------- block 2: conv3x3 -> maxpool2 -> bias -> ReLU ---------------
        v = v_ref[...]                                        # (8,128) packed vectors
        r2 = jnp.dot(x2_ref[...], w_ref[o_t2:o_t2 + 3 * WC1, :],
                     preferred_element_type=f32)              # (2*HhN, 2*WC2)
        c2 = jnp.maximum(r2[0:HhN, :], r2[HhN:2 * HhN, :])    # pool over dy (aligned)
        p2 = jnp.maximum(c2[:, 0:WC2], c2[:, WC2:2 * WC2])    # pool over dx
        feat = jnp.maximum(p2 + v[0:1, 0:WC2], 0.0)           # (HhN, WC2) rows (ip2, n)

        # -------- linear_1: one dot + diagonal-block sum over ip2 ------------
        rh = jnp.dot(feat, w_ref[o_l1:o_l1 + WC2, :],
                     preferred_element_type=f32)              # (HhN, 2*WC2)
        h = None
        for r in range(Hp2):
            blk = rh[r * N:(r + 1) * N, :]
            blk = blk[:, r * 20:(r + 1) * 20]
            h = blk if h is None else h + blk
        h = h + v[1:2, 0:20]
        h = jnp.where(h >= 0, h, LEAKY_SLOPE * h)             # leaky_relu, (N, 20)

        # -------- linear_2 / linear_3 on the VPU ------------------------------
        out = jnp.zeros((N, 1), f32) + v[7:8, 0:1]            # linear_3 bias
        for j in range(3):
            hj = jnp.sum(h * v[2 + j:3 + j, 0:20], axis=-1, keepdims=True)
            hj = hj + v[5:6, j:j + 1]
            hj = jnp.where(hj >= 0, hj, LEAKY_SLOPE * hj)
            out = out + hj * v[6:7, j:j + 1]
        out_ref[...] = out

    vmem = pl.BlockSpec(memory_space=pltpu.MemorySpace.VMEM)
    return pl.pallas_call(
        kernel,
        out_shape=jax.ShapeDtypeStruct((N, 1), jnp.float32),
        in_specs=[vmem, vmem, vmem],
        out_specs=vmem,
        scratch_shapes=[pltpu.VMEM((2 * HhN, 3 * WC1), jnp.float32)],
    )(a1, prep["w_slab"], prep["v_slab"])


# ----------------------------- pure-JAX reference ----------------------------


def reference_forward(params, x_nchw, kernel_sizes, extra_padding):
    x = x_nchw
    for (w, b), k, ep in zip(params["conv"], kernel_sizes, extra_padding):
        p = (k - 1) // 2 + ep
        x = lax.conv_general_dilated(
            x, w, (1, 1), [(p, p), (p, p)],
            dimension_numbers=("NCHW", "OIHW", "NCHW"),
        ) + b[None, :, None, None]
        x = lax.reduce_window(x, -jnp.inf, lax.max, (1, 1, 2, 2), (1, 1, 2, 2), "VALID")
        x = jnp.maximum(x, 0.0)
    feat = x.reshape(x.shape[0], -1)
    (w1, b1), (w2, b2), (w3, b3) = params["lin"]
    h = feat @ w1.T + b1
    h = jnp.where(h >= 0, h, LEAKY_SLOPE * h)
    h = h @ w2.T + b2
    h = jnp.where(h >= 0, h, LEAKY_SLOPE * h)
    return h @ w3.T + b3


# --------------------------------- main --------------------------------------

if __name__ == "__main__":
    # Module config: SimpleCNNModelV3(input_c=4, input_h=16, input_w=16,
    #                                 kernel_sizes=[3,3], extra_padding=[0,0])
    batch, input_c, input_h, input_w = 2, 4, 16, 16
    kernel_sizes = (3, 3)
    extra_padding = (0, 0)

    root = jax.random.PRNGKey(0)
    k_x, k_p = jax.random.split(root)
    x = jax.random.normal(k_x, (batch, input_c, input_h, input_w), jnp.float32)
    params = init_params(k_p, input_c, input_h, input_w, kernel_sizes, extra_padding)
    prep = prepare_params(params, input_c, input_h, input_w, kernel_sizes, extra_padding)

    fwd = jax.jit(fused_forward)
    out = jax.block_until_ready(fwd(prep, x))

    ref = jax.block_until_ready(reference_forward(params, x, kernel_sizes, extra_padding))
    assert out.shape == (batch, 1), out.shape
    np.testing.assert_allclose(np.asarray(out), np.asarray(ref), rtol=1e-4, atol=1e-4)

    print("KERNEL_OK")
</pallas_src>

<mosaic_0001>
module attributes {stable_mosaic.version = 11 : i64} {
  func.func @kernel(%arg0: memref<32x224xf32, #tpu.memory_space<vmem>>, %arg1: memref<480x128xf32, #tpu.memory_space<vmem>>, %arg2: memref<8x128xf32, #tpu.memory_space<vmem>>, %arg3: memref<2x1xf32, #tpu.memory_space<vmem>>, %arg4: memref<16x192xf32, #tpu.memory_space<vmem>>) attributes {dimension_semantics = [], scalar_prefetch = 0 : i64, scratch_operands = 1 : i64, tpu.core_type = #tpu.core_type<tc>} {
    %c0 = arith.constant 0 : index
    %c0_0 = arith.constant 0 : index
    %0 = vector.load %arg0[%c0, %c0_0] : memref<32x224xf32, #tpu.memory_space<vmem>>, vector<32x224xf32>
    %c0_1 = arith.constant 0 : index
    %c0_2 = arith.constant 0 : index
    %1 = vector.load %arg1[%c0_1, %c0_2] : memref<480x128xf32, #tpu.memory_space<vmem>>, vector<224x128xf32>
    %cst = arith.constant dense<0.000000e+00> : vector<32x128xf32>
    %2 = tpu.matmul %0, %1, %cst {dimension_numbers = #tpu.dot_dimension_numbers<[1], [0], [0], [1], [0, 0, 1, 1], [], []>} : vector<32x224xf32>, vector<224x128xf32>, vector<32x128xf32> -> vector<32x128xf32>
    %3 = vector.extract_strided_slice %2 {offsets = [0, 0], sizes = [16, 128], strides = [1, 1]} : vector<32x128xf32> to vector<16x128xf32>
    %4 = vector.extract_strided_slice %2 {offsets = [16, 0], sizes = [16, 128], strides = [1, 1]} : vector<32x128xf32> to vector<16x128xf32>
    %5 = arith.maximumf %3, %4 : vector<16x128xf32>
    %6 = vector.extract_strided_slice %5 {offsets = [0, 0], sizes = [16, 64], strides = [1, 1]} : vector<16x128xf32> to vector<16x64xf32>
    %7 = vector.extract_strided_slice %5 {offsets = [0, 64], sizes = [16, 64], strides = [1, 1]} : vector<16x128xf32> to vector<16x64xf32>
    %8 = arith.maximumf %6, %7 : vector<16x64xf32>
    %cst_3 = arith.constant 0.000000e+00 : f32
    %9 = vector.broadcast %cst_3 : f32 to vector<16x64xf32>
    %10 = arith.maximumf %8, %9 : vector<16x64xf32>
    %cst_4 = arith.constant 0.000000e+00 : f32
    %11 = vector.broadcast %cst_4 : f32 to vector<2x64xf32>
    %c0_5 = arith.constant 0 : index
    %c64 = arith.constant 64 : index
    %12 = vector.load %arg4[%c0_5, %c64] : memref<16x192xf32, #tpu.memory_space<vmem>>, vector<16x64xf32>
    tpu.vector_store %arg4[%c0_5, %c64], %10 {strides = array<i32>} : memref<16x192xf32, #tpu.memory_space<vmem>>, vector<16x64xf32>,
    %c0_6 = arith.constant 0 : index
    %c0_7 = arith.constant 0 : index
    %13 = vector.load %arg4[%c0_6, %c0_7] : memref<16x192xf32, #tpu.memory_space<vmem>>, vector<2x64xf32>
    tpu.vector_store %arg4[%c0_6, %c0_7], %11 {strides = array<i32>} : memref<16x192xf32, #tpu.memory_space<vmem>>, vector<2x64xf32>,
    %14 = vector.extract_strided_slice %10 {offsets = [8, 0], sizes = [6, 64], strides = [1, 1]} : vector<16x64xf32> to vector<6x64xf32>
    %c2 = arith.constant 2 : index
    %c0_8 = arith.constant 0 : index
    %15 = vector.load %arg4[%c2, %c0_8] : memref<16x192xf32, #tpu.memory_space<vmem>>, vector<6x64xf32>
    tpu.vector_store %arg4[%c2, %c0_8], %14 {strides = array<i32>} : memref<16x192xf32, #tpu.memory_space<vmem>>, vector<6x64xf32>,
    %16 = vector.extract_strided_slice %10 {offsets = [0, 0], sizes = [8, 64], strides = [1, 1]} : vector<16x64xf32> to vector<8x64xf32>
    %c8 = arith.constant 8 : index
    %c0_9 = arith.constant 0 : index
    %17 = vector.load %arg4[%c8, %c0_9] : memref<16x192xf32, #tpu.memory_space<vmem>>, vector<8x64xf32>
    tpu.vector_store %arg4[%c8, %c0_9], %16 {strides = array<i32>} : memref<16x192xf32, #tpu.memory_space<vmem>>, vector<8x64xf32>,
    %18 = vector.extract_strided_slice %10 {offsets = [8, 0], sizes = [8, 64], strides = [1, 1]} : vector<16x64xf32> to vector<8x64xf32>
    %c0_10 = arith.constant 0 : index
    %c128 = arith.constant 128 : index
    %19 = vector.load %arg4[%c0_10, %c128] : memref<16x192xf32, #tpu.memory_space<vmem>>, vector<8x64xf32>
    tpu.vector_store %arg4[%c0_10, %c128], %18 {strides = array<i32>} : memref<16x192xf32, #tpu.memory_space<vmem>>, vector<8x64xf32>,
    %20 = vector.extract_strided_slice %10 {offsets = [2, 0], sizes = [6, 64], strides = [1, 1]} : vector<16x64xf32> to vector<6x64xf32>
    %c8_11 = arith.constant 8 : index
    %c128_12 = arith.constant 128 : index
    %21 = vector.load %arg4[%c8_11, %c128_12] : memref<16x192xf32, #tpu.memory_space<vmem>>, vector<6x64xf32>
    tpu.vector_store %arg4[%c8_11, %c128_12], %20 {strides = array<i32>} : memref<16x192xf32, #tpu.memory_space<vmem>>, vector<6x64xf32>,
    %c14 = arith.constant 14 : index
    %c128_13 = arith.constant 128 : index
    %22 = vector.load %arg4[%c14, %c128_13] : memref<16x192xf32, #tpu.memory_space<vmem>>, vector<2x64xf32>
    tpu.vector_store %arg4[%c14, %c128_13], %11 {strides = array<i32>} : memref<16x192xf32, #tpu.memory_space<vmem>>, vector<2x64xf32>,
    %c0_14 = arith.constant 0 : index
    %c0_15 = arith.constant 0 : index
    %23 = vector.load %arg2[%c0_14, %c0_15] : memref<8x128xf32, #tpu.memory_space<vmem>>, vector<8x128xf32>
    %c0_16 = arith.constant 0 : index
    %c0_17 = arith.constant 0 : index
    %24 = vector.load %arg4[%c0_16, %c0_17] : memref<16x192xf32, #tpu.memory_space<vmem>>, vector<16x192xf32>
    %c224 = arith.constant 224 : index
    %c0_18 = arith.constant 0 : index
    %25 = vector.load %arg1[%c224, %c0_18] : memref<480x128xf32, #tpu.memory_space<vmem>>, vector<192x128xf32>
    %cst_19 = arith.constant dense<0.000000e+00> : vector<16x128xf32>
    %26 = tpu.matmul %24, %25, %cst_19 {dimension_numbers = #tpu.dot_dimension_numbers<[1], [0], [0], [1], [0, 0, 1, 1], [], []>} : vector<16x192xf32>, vector<192x128xf32>, vector<16x128xf32> -> vector<16x128xf32>
    %27 = vector.extract_strided_slice %26 {offsets = [0, 0], sizes = [8, 128], strides = [1, 1]} : vector<16x128xf32> to vector<8x128xf32>
    %28 = vector.extract_strided_slice %26 {offsets = [8, 0], sizes = [8, 128], strides = [1, 1]} : vector<16x128xf32> to vector<8x128xf32>
    %29 = arith.maximumf %27, %28 : vector<8x128xf32>
    %30 = vector.extract_strided_slice %29 {offsets = [0, 0], sizes = [8, 64], strides = [1, 1]} : vector<8x128xf32> to vector<8x64xf32>
    %31 = vector.extract_strided_slice %29 {offsets = [0, 64], sizes = [8, 64], strides = [1, 1]} : vector<8x128xf32> to vector<8x64xf32>
    %32 = arith.maximumf %30, %31 : vector<8x64xf32>
    %33 = vector.extract_strided_slice %23 {offsets = [0, 0], sizes = [1, 64], strides = [1, 1]} : vector<8x128xf32> to vector<1x64xf32>
    %34 = vector.broadcast %33 : vector<1x64xf32> to vector<8x64xf32>
    %35 = arith.addf %32, %34 : vector<8x64xf32>
    %cst_20 = arith.constant 0.000000e+00 : f32
    %36 = vector.broadcast %cst_20 : f32 to vector<8x64xf32>
    %37 = arith.maximumf %35, %36 : vector<8x64xf32>
    %c416 = arith.constant 416 : index
    %c0_21 = arith.constant 0 : index
    %38 = vector.load %arg1[%c416, %c0_21] : memref<480x128xf32, #tpu.memory_space<vmem>>, vector<64x128xf32>
    %cst_22 = arith.constant dense<0.000000e+00> : vector<8x128xf32>
    %39 = tpu.matmul %37, %38, %cst_22 {dimension_numbers = #tpu.dot_dimension_numbers<[1], [0], [0], [1], [0, 0, 1, 1], [], []>} : vector<8x64xf32>, vector<64x128xf32>, vector<8x128xf32> -> vector<8x128xf32>
    %40 = vector.extract_strided_slice %39 {offsets = [0, 0], sizes = [2, 128], strides = [1, 1]} : vector<8x128xf32> to vector<2x128xf32>
    %41 = vector.extract_strided_slice %40 {offsets = [0, 0], sizes = [2, 20], strides = [1, 1]} : vector<2x128xf32> to vector<2x20xf32>
    %42 = vector.extract_strided_slice %39 {offsets = [2, 0], sizes = [2, 128], strides = [1, 1]} : vector<8x128xf32> to vector<2x128xf32>
    %43 = vector.extract_strided_slice %42 {offsets = [0, 20], sizes = [2, 20], strides = [1, 1]} : vector<2x128xf32> to vector<2x20xf32>
    %44 = arith.addf %41, %43 : vector<2x20xf32>
    %45 = vector.extract_strided_slice %39 {offsets = [4, 0], sizes = [2, 128], strides = [1, 1]} : vector<8x128xf32> to vector<2x128xf32>
    %46 = vector.extract_strided_slice %45 {offsets = [0, 40], sizes = [2, 20], strides = [1, 1]} : vector<2x128xf32> to vector<2x20xf32>
    %47 = arith.addf %44, %46 : vector<2x20xf32>
    %48 = vector.extract_strided_slice %39 {offsets = [6, 0], sizes = [2, 128], strides = [1, 1]} : vector<8x128xf32> to vector<2x128xf32>
    %49 = vector.extract_strided_slice %48 {offsets = [0, 60], sizes = [2, 20], strides = [1, 1]} : vector<2x128xf32> to vector<2x20xf32>
    %50 = arith.addf %47, %49 : vector<2x20xf32>
    %51 = vector.extract_strided_slice %23 {offsets = [1, 0], sizes = [1, 20], strides = [1, 1]} : vector<8x128xf32> to vector<1x20xf32>
    %52 = vector.broadcast %51 : vector<1x20xf32> to vector<2x20xf32>
    %53 = arith.addf %50, %52 : vector<2x20xf32>
    %cst_23 = arith.constant 0.000000e+00 : f32
    %54 = vector.broadcast %cst_23 : f32 to vector<2x20xf32>
    %55 = arith.cmpf oge, %53, %54 : vector<2x20xf32>
    %cst_24 = arith.constant 0.00999999977 : f32
    %56 = vector.broadcast %cst_24 : f32 to vector<2x20xf32>
    %57 = arith.mulf %56, %53 : vector<2x20xf32>
    %58 = arith.select %55, %53, %57 : vector<2x20xi1>, vector<2x20xf32>
    %cst_25 = arith.constant 0.000000e+00 : f32
    %59 = vector.broadcast %cst_25 : f32 to vector<2x1xf32>
    %60 = vector.extract_strided_slice %23 {offsets = [7, 0], sizes = [1, 1], strides = [1, 1]} : vector<8x128xf32> to vector<1x1xf32>
    %61 = vector.broadcast %60 : vector<1x1xf32> to vector<2x1xf32>
    %62 = arith.addf %59, %61 : vector<2x1xf32>
    %63 = vector.extract_strided_slice %23 {offsets = [2, 0], sizes = [1, 20], strides = [1, 1]} : vector<8x128xf32> to vector<1x20xf32>
    %64 = vector.broadcast %63 : vector<1x20xf32> to vector<2x20xf32>
    %65 = arith.mulf %58, %64 : vector<2x20xf32>
    %cst_26 = arith.constant dense<0.000000e+00> : vector<2xf32>
    %66 = vector.multi_reduction <add>, %65, %cst_26 [1] : vector<2x20xf32> to vector<2xf32>
    %67 = vector.shape_cast %66 : vector<2xf32> to vector<2x1xf32>
    %68 = vector.extract_strided_slice %23 {offsets = [5, 0], sizes = [1, 1], strides = [1, 1]} : vector<8x128xf32> to vector<1x1xf32>
    %69 = vector.broadcast %68 : vector<1x1xf32> to vector<2x1xf32>
    %70 = arith.addf %67, %69 : vector<2x1xf32>
    %cst_27 = arith.constant 0.000000e+00 : f32
    %71 = vector.broadcast %cst_27 : f32 to vector<2x1xf32>
    %72 = arith.cmpf oge, %70, %71 : vector<2x1xf32>
    %cst_28 = arith.constant 0.00999999977 : f32
    %73 = vector.broadcast %cst_28 : f32 to vector<2x1xf32>
    %74 = arith.mulf %73, %70 : vector<2x1xf32>
    %75 = arith.select %72, %70, %74 : vector<2x1xi1>, vector<2x1xf32>
    %76 = vector.extract_strided_slice %23 {offsets = [6, 0], sizes = [1, 1], strides = [1, 1]} : vector<8x128xf32> to vector<1x1xf32>
    %77 = vector.broadcast %76 : vector<1x1xf32> to vector<2x1xf32>
    %78 = arith.mulf %75, %77 : vector<2x1xf32>
    %79 = arith.addf %62, %78 : vector<2x1xf32>
    %80 = vector.extract_strided_slice %23 {offsets = [3, 0], sizes = [1, 20], strides = [1, 1]} : vector<8x128xf32> to vector<1x20xf32>
    %81 = vector.broadcast %80 : vector<1x20xf32> to vector<2x20xf32>
    %82 = arith.mulf %58, %81 : vector<2x20xf32>
    %cst_29 = arith.constant dense<0.000000e+00> : vector<2xf32>
    %83 = vector.multi_reduction <add>, %82, %cst_29 [1] : vector<2x20xf32> to vector<2xf32>
    %84 = vector.shape_cast %83 : vector<2xf32> to vector<2x1xf32>
    %85 = vector.extract_strided_slice %23 {offsets = [5, 1], sizes = [1, 1], strides = [1, 1]} : vector<8x128xf32> to vector<1x1xf32>
    %86 = vector.broadcast %85 : vector<1x1xf32> to vector<2x1xf32>
    %87 = arith.addf %84, %86 : vector<2x1xf32>
    %cst_30 = arith.constant 0.000000e+00 : f32
    %88 = vector.broadcast %cst_30 : f32 to vector<2x1xf32>
    %89 = arith.cmpf oge, %87, %88 : vector<2x1xf32>
    %cst_31 = arith.constant 0.00999999977 : f32
    %90 = vector.broadcast %cst_31 : f32 to vector<2x1xf32>
    %91 = arith.mulf %90, %87 : vector<2x1xf32>
    %92 = arith.select %89, %87, %91 : vector<2x1xi1>, vector<2x1xf32>
    %93 = vector.extract_strided_slice %23 {offsets = [6, 1], sizes = [1, 1], strides = [1, 1]} : vector<8x128xf32> to vector<1x1xf32>
    %94 = vector.broadcast %93 : vector<1x1xf32> to vector<2x1xf32>
    %95 = arith.mulf %92, %94 : vector<2x1xf32>
    %96 = arith.addf %79, %95 : vector<2x1xf32>
    %97 = vector.extract_strided_slice %23 {offsets = [4, 0], sizes = [1, 20], strides = [1, 1]} : vector<8x128xf32> to vector<1x20xf32>
    %98 = vector.broadcast %97 : vector<1x20xf32> to vector<2x20xf32>
    %99 = arith.mulf %58, %98 : vector<2x20xf32>
    %cst_32 = arith.constant dense<0.000000e+00> : vector<2xf32>
    %100 = vector.multi_reduction <add>, %99, %cst_32 [1] : vector<2x20xf32> to vector<2xf32>
    %101 = vector.shape_cast %100 : vector<2xf32> to vector<2x1xf32>
    %102 = vector.extract_strided_slice %23 {offsets = [5, 2], sizes = [1, 1], strides = [1, 1]} : vector<8x128xf32> to vector<1x1xf32>
    %103 = vector.broadcast %102 : vector<1x1xf32> to vector<2x1xf32>
    %104 = arith.addf %101, %103 : vector<2x1xf32>
    %cst_33 = arith.constant 0.000000e+00 : f32
    %105 = vector.broadcast %cst_33 : f32 to vector<2x1xf32>
    %106 = arith.cmpf oge, %104, %105 : vector<2x1xf32>
    %cst_34 = arith.constant 0.00999999977 : f32
    %107 = vector.broadcast %cst_34 : f32 to vector<2x1xf32>
    %108 = arith.mulf %107, %104 : vector<2x1xf32>
    %109 = arith.select %106, %104, %108 : vector<2x1xi1>, vector<2x1xf32>
    %110 = vector.extract_strided_slice %23 {offsets = [6, 2], sizes = [1, 1], strides = [1, 1]} : vector<8x128xf32> to vector<1x1xf32>
    %111 = vector.broadcast %110 : vector<1x1xf32> to vector<2x1xf32>
    %112 = arith.mulf %109, %111 : vector<2x1xf32>
    %113 = arith.addf %96, %112 : vector<2x1xf32>
    %c0_35 = arith.constant 0 : index
    %c0_36 = arith.constant 0 : index
    %114 = vector.load %arg3[%c0_35, %c0_36] : memref<2x1xf32, #tpu.memory_space<vmem>>, vector<2x1xf32>
    tpu.vector_store %arg3[%c0_35, %c0_36], %113 {strides = array<i32>} : memref<2x1xf32, #tpu.memory_space<vmem>>, vector<2x1xf32>,
    return
  }
}

</mosaic_0001>

<bundles_post_ra>
// kernel: fused_forward.1
= control target key start
LH: loop header
LB: loop body
LE: loop exit
PB: predicated region body
PF: predicated region fallthrough
CT: control target
= control target key end

     0   :  { %v528_v0 = vmov 0.0   ;;  %vm50_vm0 = vcmask 785408   ;;  %vm186_vm1 = vcmask 523270   ;;  %s529_s30 = smov 64   ;;  %vm184_vm2 = vcmask 521216   ;;  %s533_s15 = smov 68   ;;  %s871_s1 = inlined_call_operand.vmem [shape: f32[480,128], index: 1, kind: input, shape index: {}]   ;;  %s872_s0 = inlined_call_operand.vmem [shape: f32[32,224], index: 0, kind: input, shape index: {}]   ;;  %s873_s2 = inlined_call_operand.vmem [shape: f32[8,128], index: 2, kind: input, shape index: {}]   ;;  %s874_s3 = inlined_call_operand.vmem [shape: f32[2,1], index: 3, kind: output, shape index: {}]  }
   0x1   :  { %63 = vmatprep.subr.mxu0 %v528_v0  ;;  %v37_v1 = vld [vmem:[%s871_s1 + $0x78] sm:$0xff]  ;;  %v36_v2 = vld [vmem:[%s871_s1 + $0x70] sm:$0xff]  ;;  %223 = vmatprep.subr.mxu1 %v528_v0  ;;  %v35_v3 = vld [vmem:[%s871_s1 + $0x68] sm:$0xff]  ;;  %187 = vst.msk [vmem:[#allocation2 + $0x18] sm:$0xc0] %vm186_vm1, %v528_v0  ;;  %vm179_vm3 = vcmask 523264  }
   0x2   :  { %64 = vmatpush1.msra.mxu0 %v37_v1  ;;  %v34_v4 = vld [vmem:[%s871_s1 + $0x60] sm:$0xff]  ;;  %v33_v5 = vld [vmem:[%s871_s1 + $0x58] sm:$0xff]  ;;  %v32_v6 = vld [vmem:[%s871_s1 + $0x50] sm:$0xff]  ;;  %vm170_vm4 = vcmask 1048064   ;;  %vm173_vm5 = vcmask 517120   ;;  %vm177_vm6 = vcmask 523266  }
   0x3   :  { %65 = vmatprep.subr.mxu0 %v528_v0  ;;  %v15_v7 = vld [vmem:[%s872_s0 + $0x8] sm:$0xff]  ;;  %v30_v9 = vld [vmem:[%s871_s1 + $0x40] sm:$0xff]  ;;  %v29_v10 = vld [vmem:[%s871_s1 + $0x38] sm:$0xff]  ;;  %vm530_vm7 = vmmov 0   ;;  %vm425_vm9 = vcmask 156672   ;;  %s535_s16 = smov 127  }
   0x4   :  { %66 = vmatpush1.msra.mxu0 %v36_v2  ;;  %v31_v8 = vld [vmem:[%s871_s1 + $0x48] sm:$0xff]  ;;  %485 = vmatprep.mubr.msk.f32.mxu0 %vm50_vm0, %v15_v7  ;;  %v28_v11 = vld [vmem:[%s871_s1 + $0x30] sm:$0xff]  ;;  %v26_v13 = vld [vmem:[%s871_s1 + $0x20] sm:$0xff]  ;;  %vm479_vm13 = vcmask 1024  }
   0x5   :  { %67 = vmatprep.subr.mxu0 %v528_v0  ;;  %v27_v12 = vld [vmem:[%s871_s1 + $0x28] sm:$0xff]  ;;  %v25_v14 = vld [vmem:[%s871_s1 + $0x18] sm:$0xff]  ;;  %v24_v15 = vld [vmem:[%s871_s1 + $0x10] sm:$0xff] }
   0x6   :  { %68 = vmatpush1.msra.mxu0 %v35_v3  ;;  %v23_v16 = vld [vmem:[%s871_s1 + $0x8] sm:$0xff]  ;;  %v22_v17 = vld [vmem:[%s871_s1] sm:$0xff]  ;;  %v49_v18 = vld [vmem:[%s871_s1 + $0xd8] sm:$0xff] }
   0x7   :  { %69 = vmatprep.subr.mxu0 %v528_v0  ;;  %v48_v19 = vld [vmem:[%s871_s1 + $0xd0] sm:$0xff]  ;;  %v47_v20 = vld [vmem:[%s871_s1 + $0xc8] sm:$0xff]  ;;  %v46_v21 = vld [vmem:[%s871_s1 + $0xc0] sm:$0xff] }
   0x8   :  { %70 = vmatpush1.msra.mxu0 %v34_v4  ;;  %v45_v22 = vld [vmem:[%s871_s1 + $0xb8] sm:$0xff]  ;;  %v44_v23 = vld [vmem:[%s871_s1 + $0xb0] sm:$0xff]  ;;  %v43_v24 = vld [vmem:[%s871_s1 + $0xa8] sm:$0xff] }
   0x9   :  { %71 = vmatprep.subr.mxu0 %v528_v0  ;;  %v42_v25 = vld [vmem:[%s871_s1 + $0xa0] sm:$0xff]  ;;  %v41_v26 = vld [vmem:[%s871_s1 + $0x98] sm:$0xff]  ;;  %v40_v27 = vld [vmem:[%s871_s1 + $0x90] sm:$0xff] }
   0xa   :  { %72 = vmatpush1.msra.mxu0 %v33_v5  ;;  %v39_v28 = vld [vmem:[%s871_s1 + $0x88] sm:$0xff]  ;;  %v38_v29 = vld [vmem:[%s871_s1 + $0x80] sm:$0xff]  ;;  %v17_v31 = vld [vmem:[%s872_s0 + $0x18] sm:$0xff] }
   0xb   :  { %73 = vmatprep.subr.mxu0 %v528_v0  ;;  %v14_v30 = vld [vmem:[%s872_s0] sm:$0xff]  ;;  %v16_v32 = vld [vmem:[%s872_s0 + $0x10] sm:$0xff]  ;;  %v19_v33 = vld [vmem:[%s872_s0 + $0x28] sm:$0xff] }
   0xc   :  { %74 = vmatpush1.msra.mxu0 %v32_v6  ;;  %v18_v34 = vld [vmem:[%s872_s0 + $0x20] sm:$0xff]  ;;  %v21_v35 = vld [vmem:[%s872_s0 + $0x38] sm:$0xff]  ;;  %v20_v36 = vld [vmem:[%s872_s0 + $0x30] sm:$0xff] }
   0xd   :  { %75 = vmatprep.subr.mxu0 %v528_v0  ;;  %v208_v47 = vld [vmem:[%s871_s1 + $0x158] sm:$0xff]  ;;  %v207_v48 = vld [vmem:[%s871_s1 + $0x150] sm:$0xff]  ;;  %v206_v49 = vld [vmem:[%s871_s1 + $0x148] sm:$0xff] }
   0xe   :  { %76 = vmatpush1.msra.mxu0 %v31_v8  ;;  %224 = vmatpush1.msra.mxu1 %v208_v47  ;;  %v205_v50 = vld [vmem:[%s871_s1 + $0x140] sm:$0xff]  ;;  %v204_v51 = vld [vmem:[%s871_s1 + $0x138] sm:$0xff]  ;;  %v203_v52 = vld [vmem:[%s871_s1 + $0x130] sm:$0xff] }
   0xf   :  { %77 = vmatprep.subr.mxu0 %v528_v0  ;;  %225 = vmatprep.subr.mxu1 %v528_v0  ;;  %v202_v53 = vld [vmem:[%s871_s1 + $0x128] sm:$0xff]  ;;  %v201_v54 = vld [vmem:[%s871_s1 + $0x120] sm:$0xff]  ;;  %v200_v55 = vld [vmem:[%s871_s1 + $0x118] sm:$0xff] }
  0x10   :  { %78 = vmatpush1.msra.mxu0 %v30_v9  ;;  %226 = vmatpush1.msra.mxu1 %v207_v48  ;;  %v199_v56 = vld [vmem:[%s871_s1 + $0x110] sm:$0xff]  ;;  %v198_v57 = vld [vmem:[%s871_s1 + $0x108] sm:$0xff]  ;;  %v197_v58 = vld [vmem:[%s871_s1 + $0x100] sm:$0xff] }
  0x11   :  { %79 = vmatprep.subr.mxu0 %v528_v0  ;;  %227 = vmatprep.subr.mxu1 %v528_v0  ;;  %v196_v59 = vld [vmem:[%s871_s1 + $0xf8] sm:$0xff]  ;;  %v195_v60 = vld [vmem:[%s871_s1 + $0xf0] sm:$0xff]  ;;  %v194_v61 = vld [vmem:[%s871_s1 + $0xe8] sm:$0xff] }
  0x12   :  { %80 = vmatpush1.msra.mxu0 %v29_v10  ;;  %228 = vmatpush1.msra.mxu1 %v206_v49  ;;  %v193_v62 = vld [vmem:[%s871_s1 + $0xe0] sm:$0xff]  ;;  %v216_v63 = vld [vmem:[%s871_s1 + $0x198] sm:$0xff]  ;;  %v215_v1 = vld [vmem:[%s871_s1 + $0x190] sm:$0xff] }
  0x13   :  { %81 = vmatprep.subr.mxu0 %v528_v0  ;;  %229 = vmatprep.subr.mxu1 %v528_v0  ;;  %v214_v2 = vld [vmem:[%s871_s1 + $0x188] sm:$0xff]  ;;  %v213_v3 = vld [vmem:[%s871_s1 + $0x180] sm:$0xff]  ;;  %v212_v4 = vld [vmem:[%s871_s1 + $0x178] sm:$0xff] }
  0x14   :  { %82 = vmatpush1.msra.mxu0 %v28_v11  ;;  %230 = vmatpush1.msra.mxu1 %v205_v50  ;;  %v211_v5 = vld [vmem:[%s871_s1 + $0x170] sm:$0xff]  ;;  %v210_v6 = vld [vmem:[%s871_s1 + $0x168] sm:$0xff]  ;;  %v209_v7 = vld [vmem:[%s871_s1 + $0x160] sm:$0xff] }
  0x15   :  { %83 = vmatprep.subr.mxu0 %v528_v0  ;;  %231 = vmatprep.subr.mxu1 %v528_v0 }
  0x16   :  { %84 = vmatpush1.msra.mxu0 %v27_v12  ;;  %232 = vmatpush1.msra.mxu1 %v204_v51 }
  0x17   :  { %85 = vmatprep.subr.mxu0 %v528_v0  ;;  %233 = vmatprep.subr.mxu1 %v528_v0 }
  0x18   :  { %86 = vmatpush1.msra.mxu0 %v26_v13  ;;  %234 = vmatpush1.msra.mxu1 %v203_v52 }
  0x19   :  { %87 = vmatprep.subr.mxu0 %v528_v0  ;;  %235 = vmatprep.subr.mxu1 %v528_v0 }
  0x1a   :  { %88 = vmatpush1.msra.mxu0 %v25_v14  ;;  %236 = vmatpush1.msra.mxu1 %v202_v53 }
  0x1b   :  { %89 = vmatprep.subr.mxu0 %v528_v0  ;;  %237 = vmatprep.subr.mxu1 %v528_v0 }
  0x1c   :  { %90 = vmatpush1.msra.mxu0 %v24_v15  ;;  %238 = vmatpush1.msra.mxu1 %v201_v54 }
  0x1d   :  { %91 = vmatprep.subr.mxu0 %v528_v0  ;;  %239 = vmatprep.subr.mxu1 %v528_v0 }
  0x1e   :  { %92 = vmatpush1.msra.mxu0 %v23_v16  ;;  %240 = vmatpush1.msra.mxu1 %v200_v55 }
  0x1f   :  { %93 = vmatprep.subr.mxu0 %v528_v0  ;;  %241 = vmatprep.subr.mxu1 %v528_v0 }
  0x20   :  { %94 = vmatpush1.msra.mxu0 %v22_v17  ;;  %242 = vmatpush1.msra.mxu1 %v199_v56 }
  0x21   :  { %103 = vmatprep.subr.mxu0 %v528_v0  ;;  %243 = vmatprep.subr.mxu1 %v528_v0 }
  0x22   :  { %104 = vmatpush2.msra.mxu0 %v49_v18  ;;  %244 = vmatpush1.msra.mxu1 %v198_v57 }
  0x23   :  { %105 = vmatprep.subr.mxu0 %v528_v0  ;;  %245 = vmatprep.subr.mxu1 %v528_v0 }
  0x24   :  { %106 = vmatpush2.msra.mxu0 %v48_v19  ;;  %246 = vmatpush1.msra.mxu1 %v197_v58 }
  0x25   :  { %107 = vmatprep.subr.mxu0 %v528_v0  ;;  %247 = vmatprep.subr.mxu1 %v528_v0 }
  0x26   :  { %108 = vmatpush2.msra.mxu0 %v47_v20  ;;  %248 = vmatpush1.msra.mxu1 %v196_v59 }
  0x27   :  { %109 = vmatprep.subr.mxu0 %v528_v0  ;;  %249 = vmatprep.subr.mxu1 %v528_v0 }
  0x28   :  { %110 = vmatpush2.msra.mxu0 %v46_v21  ;;  %250 = vmatpush1.msra.mxu1 %v195_v60 }
  0x29   :  { %111 = vmatprep.subr.mxu0 %v528_v0  ;;  %251 = vmatprep.subr.mxu1 %v528_v0 }
  0x2a   :  { %112 = vmatpush2.msra.mxu0 %v45_v22  ;;  %252 = vmatpush1.msra.mxu1 %v194_v61  ;;  %v317_v22 = vld [vmem:[%s871_s1 + $0x1d8] sm:$0xff] }
  0x2b   :  { %113 = vmatprep.subr.mxu0 %v528_v0  ;;  %253 = vmatprep.subr.mxu1 %v528_v0 }
  0x2c   :  { %114 = vmatpush2.msra.mxu0 %v44_v23  ;;  %254 = vmatpush1.msra.mxu1 %v193_v62  ;;  %v316_v23 = vld [vmem:[%s871_s1 + $0x1d0] sm:$0xff] }
  0x2d   :  { %115 = vmatprep.subr.mxu0 %v528_v0  ;;  %271 = vmatprep.subr.mxu1 %v528_v0 }
  0x2e   :  { %116 = vmatpush2.msra.mxu0 %v43_v24  ;;  %272 = vmatpush2.msra.mxu1 %v216_v63  ;;  %v315_v24 = vld [vmem:[%s871_s1 + $0x1c8] sm:$0xff] }
  0x2f   :  { %117 = vmatprep.subr.mxu0 %v528_v0  ;;  %273 = vmatprep.subr.mxu1 %v528_v0 }
  0x30   :  { %118 = vmatpush2.msra.mxu0 %v42_v25  ;;  %274 = vmatpush2.msra.mxu1 %v215_v1  ;;  %v314_v25 = vld [vmem:[%s871_s1 + $0x1c0] sm:$0xff] }
  0x31   :  { %119 = vmatprep.subr.mxu0 %v528_v0  ;;  %275 = vmatprep.subr.mxu1 %v528_v0 }
  0x32   :  { %120 = vmatpush2.msra.mxu0 %v41_v26  ;;  %276 = vmatpush2.msra.mxu1 %v214_v2  ;;  %v313_v26 = vld [vmem:[%s871_s1 + $0x1b8] sm:$0xff] }
  0x33   :  { %121 = vmatprep.subr.mxu0 %v528_v0  ;;  %277 = vmatprep.subr.mxu1 %v528_v0 }
  0x34   :  { %122 = vmatpush2.msra.mxu0 %v40_v27  ;;  %278 = vmatpush2.msra.mxu1 %v213_v3  ;;  %v312_v27 = vld [vmem:[%s871_s1 + $0x1b0] sm:$0xff] }
  0x35   :  { %123 = vmatprep.subr.mxu0 %v528_v0  ;;  %279 = vmatprep.subr.mxu1 %v528_v0 }
  0x36   :  { %124 = vmatpush2.msra.mxu0 %v39_v28  ;;  %280 = vmatpush2.msra.mxu1 %v212_v4  ;;  %v311_v28 = vld [vmem:[%s871_s1 + $0x1a8] sm:$0xff] }
  0x37   :  { %125 = vmatprep.subr.mxu0 %v528_v0  ;;  %281 = vmatprep.subr.mxu1 %v528_v0 }
  0x38   :  { %126 = vmatpush2.msra.mxu0 %v38_v29  ;;  %282 = vmatpush2.msra.mxu1 %v211_v5  ;;  %v310_v29 = vld [vmem:[%s871_s1 + $0x1a0] sm:$0xff]  ;;  %s531_s1 = smov 88  }
  0x39   :  { %128 = vmatmul.mubr.f32.vlgmr.msra.gmra.mxu0 %v14_v30  ;;  %283 = vmatprep.subr.mxu1 %v528_v0 }
  0x3a   :  { %486 = vmatprep.mubr.msk.f32.mxu0 %vm50_vm0, %v17_v31  ;;  %284 = vmatpush2.msra.mxu1 %v210_v6 }
  0x3b   :  { %285 = vmatprep.subr.mxu1 %v528_v0 }
  0x3c   :  { %286 = vmatpush2.msra.mxu1 %v209_v7 }
  0x3d   :  { %133 = vmatmul.mubr.f32.gmra.mxu0 %v16_v32  ;;  %501 = vmatprep.subr.mxu1 %v528_v0 }
  0x3e   :  { %487 = vmatprep.mubr.msk.f32.mxu0 %vm50_vm0, %v19_v33 }
  0x41   :  { %138 = vmatmul.mubr.f32.gmra.mxu0 %v18_v34 }
  0x42   :  { %488 = vmatprep.mubr.msk.f32.mxu0 %vm50_vm0, %v21_v35  ;;  %v304_v35 = vlaneseq }
  0x45   :  { %143 = vmatmul.mubr.f32.gmra.mxu0 %v20_v36  ;;  %v844_v36 = vshrl.u32 %v304_v35, 7 }
  0x47   :  { %v409_v48 = vsub.s32 1, %v844_v36  ;;  %v463_v55 = vsub.s32 4, %v844_v36  ;;  %v445_v56 = vsub.s32 3, %v844_v36  ;;  %v422_v58 = vsub.s32 2, %v844_v36 }
  0xf9   :  { %v129_v37 = vpop.f32.mrf.mxu0 }
  0xfb   :  { %v131_v38 = vpop.f32.mrf.mxu0 }
  0xfc   :  { %v850_v38 = vld [vmem:[%s873_s2] sm:$0xff]  ;;  %s534_s2 = smov 126  }
  0xfd   :  { %v134_v39 = vpop.f32.mrf.mxu0  ;;  %v410_v53 = vrot.slane %v850_v38, %v409_v48  ;;  %v464_v60 = vrot.slane %v850_v38, %v463_v55  ;;  %v446_v61 = vrot.slane %v850_v38, %v445_v56  ;;  %v423_v63 = vrot.slane %v850_v38, %v422_v58 }
  0xff   :  { %v136_v40 = vpop.f32.mrf.mxu0 }
 0x101   :  { %v139_v41 = vpop.f32.mrf.mxu0 }
 0x102   :  { %v698_v42 = vmax.f32 %v129_v37, %v139_v41  ;;  %v306_v37 = vsub.s32 0, %v844_v36 }
 0x103   :  { %v141_v43 = vpop.f32.mrf.mxu0 }
 0x104   :  { %152 = vrot.lane.b32.xlu0 %v698_v42, %s529_s30 }
 0x105   :  { %v144_v44 = vpop.f32.mrf.mxu0 }
 0x106   :  { %v702_v45 = vmax.f32 %v134_v39, %v144_v44  ;;  %v307_v39 = vrot.slane %v850_v38, %v306_v37 }
 0x107   :  { %v146_v46 = vpop.f32.mrf.mxu0 }
 0x108   :  { %154 = vrot.lane.b32.xlu0 %v702_v45, %s529_s30 }
 0x176   :  { %v153_v8 = vpop.permute.xlu0 %152 }
 0x177   :  { %v158_v9 = vmax.f32 %v698_v42, %v153_v8  ;;  %v431_v8 = vsub.s32 5, %v844_v36 }
 0x179   :  { %v160_v10 = vmax.f32 %v158_v9, 0.0  ;;  %v432_v9 = vrot.slane %v850_v38, %v431_v8 }
 0x17a   :  { %v155_v11 = vpop.permute.xlu0 %154 }
 0x17b   :  { %v182_v12 = vrot.slane %v160_v10, 2  ;;  %v159_v13 = vmax.f32 %v702_v45, %v155_v11  ;;  %164 = vrot.lane.b32.xlu1 %v160_v10, %s529_s30 }
 0x17d   :  { %185 = vst.msk [vmem:[#allocation2 + $0x18] sm:$0x3f] %vm184_vm2, %v182_v12  ;;  %v161_v14 = vmax.f32 %v159_v13, 0.0 }
 0x17f   :  { %181 = vst.msk [vmem:[#allocation2 + $0x8] sm:$0xff] %vm179_vm3, %v161_v14  ;;  %166 = vrot.lane.b32.xlu1 %v161_v14, %s529_s30  ;;  %v175_v16 = vrot.slane %v161_v14, 6 }
 0x184   :  { %v192_v20 = vld [vmem:[#allocation2 + $0x18] sm:$0xff] }
 0x186   :  { %v190_v15 = vld [vmem:[#allocation2 + $0x8] sm:$0xff] }
 0x187   :  { %489 = vmatprep.mubr.msk.f32.mxu1 %vm179_vm3, %v190_v15 }
 0x1ed   :  { %v165_v17 = vpop.permute.xlu1 %164 }
 0x1ee   :  { %171 = vst.msk [vmem:[#allocation2] sm:$0xff] %vm170_vm4, %v165_v17 }
 0x1ef   :  { %174 = vst.msk [vmem:[#allocation2] sm:$0x3] %vm173_vm5, %v528_v0 }
 0x1f0   :  { %178 = vst.msk [vmem:[#allocation2] sm:$0xfc] %vm177_vm6, %v175_v16 }
 0x1f1   :  { %v167_v18 = vpop.permute.xlu1 %166 }
 0x1f2   :  { %172 = vst.msk [vmem:[#allocation2 + $0x10] sm:$0xff] %vm170_vm4, %v167_v18 }
 0x1f3   :  { %180 = vst.msk [vmem:[#allocation2 + $0x10] sm:$0xff] %vm179_vm3, %v160_v10  ;;  %v439_v10 = vsub.s32 6, %v844_v36 }
 0x1f5   :  { %v440_v15 = vrot.slane %v850_v38, %v439_v10 }
 0x1f7   :  { %v189_v19 = vld [vmem:[#allocation2] sm:$0xff] }
 0x1f8   :  { %288 = vmatmul.mubr.f32.vlgmr.msra.gmra.mxu1 %v189_v19 }
 0x1f9   :  { %490 = vmatprep.mubr.msk.f32.mxu1 %vm179_vm3, %v192_v20  ;;  %502 = vmatpush3.msra.mxu1 %v317_v22 }
 0x1fa   :  { %v191_v21 = vld [vmem:[#allocation2 + $0x10] sm:$0xff]  ;;  %503 = vmatprep.subr.mxu1 %v528_v0 }
 0x1fb   :  { %504 = vmatpush3.msra.mxu1 %v316_v23 }
 0x1fc   :  { %293 = vmatmul.mubr.f32.gmra.mxu1 %v191_v21  ;;  %505 = vmatprep.subr.mxu1 %v528_v0 }
 0x1fd   :  { %506 = vmatpush3.msra.mxu1 %v315_v24  ;;  %517 = vmatprep.mubr.msk.f32.mxu1 %vm530_vm7, %v528_v0 }
 0x1fe   :  { %507 = vmatprep.subr.mxu1 %v528_v0 }
 0x1ff   :  { %508 = vmatpush3.msra.mxu1 %v314_v25 }
 0x200   :  { %509 = vmatprep.subr.mxu1 %v528_v0 }
 0x201   :  { %510 = vmatpush3.msra.mxu1 %v313_v26 }
 0x202   :  { %511 = vmatprep.subr.mxu1 %v528_v0 }
 0x203   :  { %512 = vmatpush3.msra.mxu1 %v312_v27  ;;  %v417_v27 = vsub.s32 7, %v844_v36 }
 0x204   :  { %513 = vmatprep.subr.mxu1 %v528_v0 }
 0x205   :  { %514 = vmatpush3.msra.mxu1 %v311_v28  ;;  %v418_v28 = vrot.slane %v850_v38, %v417_v27 }
 0x206   :  { %515 = vmatprep.subr.mxu1 %v528_v0 }
 0x207   :  { %516 = vmatpush3.msra.mxu1 %v310_v29 }
 0x2b8   :  { %v289_v30 = vpop.f32.mrf.mxu1 }
 0x2ba   :  { %v291_v31 = vpop.f32.mrf.mxu1 }
 0x2bc   :  { %v294_v32 = vpop.f32.mrf.mxu1 }
 0x2bd   :  { %v298_v33 = vmax.f32 %v289_v30, %v294_v32 }
 0x2be   :  { %v296_v34 = vpop.f32.mrf.mxu1 }
 0x2bf   :  { %300 = vrot.lane.b32.xlu0 %v298_v33, %s529_s30  ;;  %s532_s30 = smov 108  }
 0x331   :  { %v301_v0 = vpop.permute.xlu0 %300 }
 0x332   :  { %v303_v40 = vmax.f32 %v298_v33, %v301_v0 }
 0x334   :  { %v308_v41 = vadd.f32 %v307_v39, %v303_v40 }
 0x336   :  { %v309_v42 = vmax.f32 %v308_v41, 0.0 }
 0x338   :  { %518 = vmatmul.mubr.msk.f32.vlgmr.msra.gmra.mxu1 %vm179_vm3, %v309_v42 }
 0x3f8   :  { %v387_v43 = vpop.f32.mrf.mxu1 }
 0x3f9   :  { %v397_v44 = vrot.slane %v387_v43, 4  ;;  %v392_v45 = vrot.slane %v387_v43, 2  ;;  %v402_v47 = vrot.slane %v387_v43, 6 }
 0x3fa   :  { %v519_v46 = vpop.f32.mrf.mxu1 }
 0x3fb   :  { %398 = vrot.lane.b32.xlu0 %v397_v44, %s531_s1  ;;  %393 = vrot.lane.b32.xlu1 %v392_v45, %s532_s30 }
 0x3ff   :  { %403 = vrot.lane.b32.xlu1 %v402_v47, %s533_s15 }
 0x46d   :  { %v394_v49 = vpop.permute.xlu1 %393  ;;  %v399_v51 = vpop.permute.xlu0 %398 }
 0x46e   :  { %v396_v50 = vadd.f32 %v394_v49, %v387_v43 }
 0x470   :  { %v401_v52 = vadd.f32 %v399_v51, %v396_v50 }
 0x471   :  { %v404_v54 = vpop.permute.xlu1 %403 }
 0x472   :  { %v406_v57 = vadd.f32 %v404_v54, %v401_v52 }
 0x474   :  { %v411_v59 = vadd.f32 %v410_v53, %v406_v57 }
 0x476   :  { %v413_v62 = vmul.f32 0.01, %v411_v59  ;;  %vm412_vm8 = vcmp.ge.f32.partialorder %v411_v59, 0.0 }
 0x478   :  { %v414_v1 = vsel %vm412_vm8, %v411_v59, %v413_v62 }
 0x479   :  { %v465_v2 = vmul.f32 %v464_v60, %v414_v1  ;;  %v447_v3 = vmul.f32 %v446_v61, %v414_v1  ;;  %v424_v6 = vmul.f32 %v423_v63, %v414_v1 }
 0x47b   :  { %v466_v4 = vsel %vm425_vm9, %v465_v2, 0.0  ;;  %v448_v5 = vsel %vm425_vm9, %v447_v3, 0.0  ;;  %v426_v7 = vsel %vm425_vm9, %v424_v6, 0.0 }
 0x47c   :  { %467 = vadd.xlane.f32.xlu1 %v466_v4  ;;  %449 = vadd.xlane.f32.xlu0 %v448_v5 }
 0x480   :  { %427 = vadd.xlane.f32.xlu0 %v426_v7 }
 0x505   :  { %v468_v11 = vpop.xlane.xlu1 %467  ;;  %v450_v12 = vpop.xlane.xlu0 %449 }
 0x506   :  { %v469_v13 = vadd.f32 %v468_v11, %v432_v9  ;;  %v451_v14 = vadd.f32 %v450_v12, %v432_v9 }
 0x508   :  { %vm470_vm10 = vcmp.ge.f32.partialorder %v469_v13, 0.0  ;;  %v471_v16 = vmul.f32 0.01, %v469_v13  ;;  %vm452_vm11 = vcmp.ge.f32.partialorder %v451_v14, 0.0  ;;  %v453_v17 = vmul.f32 0.01, %v451_v14 }
 0x509   :  { %v428_v18 = vpop.xlane.xlu0 %427 }
 0x50a   :  { %v433_v19 = vadd.f32 %v432_v9, %v428_v18  ;;  %v472_v20 = vsel %vm470_vm10, %v469_v13, %v471_v16  ;;  %v454_v21 = vsel %vm452_vm11, %v451_v14, %v453_v17 }
 0x50b   :  { %v473_v22 = vmul.f32 %v472_v20, %v440_v15  ;;  %v455_v23 = vmul.f32 %v454_v21, %v440_v15 }
 0x50c   :  { %vm434_vm12 = vcmp.ge.f32.partialorder %v433_v19, 0.0  ;;  %v435_v24 = vmul.f32 0.01, %v433_v19 }
 0x50d   :  { %475 = vrot.lane.b32.xlu1 %v473_v22, %s534_s2  ;;  %457 = vrot.lane.b32.xlu0 %v455_v23, %s535_s16 }
 0x50e   :  { %v436_v25 = vsel %vm434_vm12, %v433_v19, %v435_v24 }
 0x50f   :  { %v441_v26 = vmul.f32 %v440_v15, %v436_v25 }
 0x511   :  { %v442_v29 = vadd.f32 %v441_v26, %v418_v28 }
 0x57f   :  { %v458_v30 = vpop.permute.xlu0 %457  ;;  %v476_v32 = vpop.permute.xlu1 %475 }
 0x580   :  { %v460_v31 = vadd.f32 %v458_v30, %v442_v29 }
 0x582   :  { %v478_v33 = vadd.f32 %v476_v32, %v460_v31 }
 0x584   :  { %480 = vst.msk [vmem:[%s874_s3] sm:$0x3] %vm479_vm13, %v478_v33 }

</bundles_post_ra>
